<compile_context>
chip_gen: v5e
topology: v5e:2x2
jax: 0.10.0
libtpu: 0.0.40
codegen_flags: <defaults>
</compile_context>

<pallas_src>
import numpy as np
import jax
import jax.numpy as jnp
from jax import lax
from jax.experimental import pallas as pl
from jax.experimental.pallas import tpu as pltpu


# ---------------------------------------------------------------------------
# Fused kernel wrapper (kernel is a closure so it can use static H, W shifts)
# ---------------------------------------------------------------------------
def cot_attention_pallas(x, params):
    bs, C, H, W = x.shape
    HW = H * W
    KK = 9
    M = params["wa1k"].shape[0]

    xf = x.reshape(bs, C, HW)                      # free: no transpose / pad / im2col

    # Static lane shifts + validity masks for the implicit zero-padded 3x3 neighborhood.
    shifts = []
    mask_rows = []
    hh = np.arange(H)[:, None]
    ww = np.arange(W)[None, :]
    for kk in range(KK):
        oy, ox = kk // 3 - 1, kk % 3 - 1
        shifts.append(int((-(oy * W + ox)) % HW))
        valid = (hh + oy >= 0) & (hh + oy < H) & (ww + ox >= 0) & (ww + ox < W)
        mask_rows.append(valid.reshape(HW).astype(np.float32))
    masks = jnp.asarray(np.stack(mask_rows, axis=0))          # (9, HW) f32

    def kernel(x_ref, w1_ref, wa1k_ref, wa2_ref, mask_ref, scc_ref, scm_ref, out_ref):
        xc = x_ref[0]                                          # (C, HW) f32

        # 9 shifted + masked copies -> (9C, HW) "im2col" built in VMEM (no HBM blowup)
        parts = []
        for kk in range(KK):
            sh = shifts[kk]
            src = xc if sh == 0 else pltpu.roll(xc, sh, axis=1)
            if kk != 4:                                        # center offset needs no mask
                src = src * mask_ref[kk:kk + 1, :]
            parts.append(src)
        xs = jnp.concatenate(parts, axis=0).astype(jnp.bfloat16)   # (9C, HW)

        # One fused matmul: rows [0:C) key_embed, [C:2C) value_embed, [2C:2C+M) x-half
        # of attention_embed conv1.
        big = jnp.dot(w1_ref[...], xs, preferred_element_type=jnp.float32)  # (2C+M, HW)

        ks_, kb_ = scc_ref[:, 0:1], scc_ref[:, 1:2]
        vs_, vb_ = scc_ref[:, 2:3], scc_ref[:, 3:4]
        a2b = scc_ref[:, 4:5]
        a1s, a1b = scm_ref[:, 0:1], scm_ref[:, 1:2]

        k1 = jnp.maximum(big[:C] * ks_ + kb_, 0.0)             # key_embed: BN + ReLU
        v = big[C:2 * C] * vs_ + vb_                           # value_embed: BN

        h1 = jnp.dot(wa1k_ref[...], k1.astype(jnp.bfloat16),
                     preferred_element_type=jnp.float32) + big[2 * C:]
        h1 = jnp.maximum(h1 * a1s + a1b, 0.0)                  # attention conv1 BN + ReLU

        att = jnp.dot(wa2_ref[...], h1.astype(jnp.bfloat16),
                      preferred_element_type=jnp.float32) + a2b   # (C, HW), k*k mean folded

        # softmax over the spatial (lane) dim, then combine
        m = jnp.max(att, axis=-1, keepdims=True)
        e = jnp.exp(att - m)
        p = e * pl.reciprocal(jnp.sum(e, axis=-1, keepdims=True), approx=True)
        out_ref[0] = k1 + p * v

    slab_spec = pl.BlockSpec((1, C, HW), lambda b: (b, 0, 0))
    const_spec = lambda a: pl.BlockSpec(a.shape, lambda b: (0, 0))  # fetched once (index constant)

    out = pl.pallas_call(
        kernel,
        out_shape=jax.ShapeDtypeStruct((bs, C, HW), jnp.float32),
        grid=(bs,),
        in_specs=[slab_spec,
                  const_spec(params["w1"]), const_spec(params["wa1k"]),
                  const_spec(params["wa2m"]), const_spec(masks),
                  const_spec(params["scc"]), const_spec(params["scm"])],
        out_specs=slab_spec,
        compiler_params=pltpu.CompilerParams(dimension_semantics=("parallel",)),
    )(xf, params["w1"], params["wa1k"], params["wa2m"], masks,
      params["scc"], params["scm"])

    return out.reshape(bs, C, H, W)


# ---------------------------------------------------------------------------
# Deterministic parameter construction (matches nn.Module __init__ shapes)
# ---------------------------------------------------------------------------
def make_params(key, C=16, groups=4, ksize=3, factor=4):
    M = 2 * C // factor
    KK = ksize * ksize
    gsz = C // groups
    ks = jax.random.split(key, 17)

    wk_g = jax.random.normal(ks[0], (C, gsz, ksize, ksize), jnp.float32) * 0.1
    wv_oihw = jax.random.normal(ks[1], (C, C, 1, 1), jnp.float32) * 0.1
    wa1_oihw = jax.random.normal(ks[2], (M, 2 * C, 1, 1), jnp.float32) * 0.1
    wa2_oihw = jax.random.normal(ks[3], (KK * C, M, 1, 1), jnp.float32) * 0.1
    a2_bias = jax.random.normal(ks[4], (KK * C,), jnp.float32) * 0.1

    def bn(kg, kb, km, kv, n):
        gamma = jax.random.uniform(kg, (n,), jnp.float32, 0.5, 1.5)
        beta = jax.random.normal(kb, (n,), jnp.float32) * 0.1
        mean = jax.random.normal(km, (n,), jnp.float32) * 0.1
        var = jax.random.uniform(kv, (n,), jnp.float32, 0.5, 1.5)
        scale = gamma / jnp.sqrt(var + 1e-5)
        shift = beta - mean * scale
        return scale, shift

    k_scale, k_shift = bn(ks[5], ks[6], ks[7], ks[8], C)
    v_scale, v_shift = bn(ks[9], ks[10], ks[11], ks[12], C)
    a1_scale, a1_shift = bn(ks[13], ks[14], ks[15], ks[16], M)

    wk_np = np.asarray(wk_g)
    wv_np = np.asarray(wv_oihw)[:, :, 0, 0]                 # (C, C)
    wa1_np = np.asarray(wa1_oihw)[:, :, 0, 0]               # (M, 2C)
    wa2_np = np.asarray(wa2_oihw)[:, :, 0, 0]               # (9C, M)
    a2b_np = np.asarray(a2_bias)

    # Fused stage-1 weight: (2C+M, 9C) acting on the stacked 9-offset slab.
    #   rows [0:C)     grouped 3x3 conv (exact zeros outside each group block)
    #   rows [C:2C)    1x1 value conv     (center offset block only)
    #   rows [2C:2C+M) x-half of attention conv1 (center offset block only)
    w1 = np.zeros((2 * C + M, KK * C), np.float32)
    for o in range(C):
        g = o // gsz
        for cl in range(gsz):
            ci = g * gsz + cl
            for kk in range(KK):
                dy, dx = kk // ksize, kk % ksize
                w1[o, kk * C + ci] = wk_np[o, cl, dy, dx]
    ctr = KK // 2
    w1[C:2 * C, ctr * C:(ctr + 1) * C] = wv_np
    w1[2 * C:, ctr * C:(ctr + 1) * C] = wa1_np[:, C:]

    wa1k = wa1_np[:, :C]                                    # (M, C) k1-half of conv1
    wa2m = wa2_np.reshape(C, KK, M).mean(axis=1)            # (C, M) mean over k*k folded
    a2b_m = a2b_np.reshape(C, KK).mean(axis=1)              # (C,)

    scc = np.stack([np.asarray(k_scale), np.asarray(k_shift),
                    np.asarray(v_scale), np.asarray(v_shift), a2b_m], axis=1)  # (C, 5)
    scm = np.stack([np.asarray(a1_scale), np.asarray(a1_shift)], axis=1)       # (M, 2)

    return dict(
        # raw params (for the reference)
        wk_g=wk_g, wv_oihw=wv_oihw, wa1_oihw=wa1_oihw, wa2_oihw=wa2_oihw,
        a2_bias=a2_bias, k_scale=k_scale, k_shift=k_shift,
        v_scale=v_scale, v_shift=v_shift, a1_scale=a1_scale, a1_shift=a1_shift,
        groups=groups, ksize=ksize,
        # packed kernel params (bf16 for MXU operands, f32 for affine constants)
        w1=jnp.asarray(w1, jnp.bfloat16),
        wa1k=jnp.asarray(wa1k, jnp.bfloat16),
        wa2m=jnp.asarray(wa2m, jnp.bfloat16),
        scc=jnp.asarray(scc, jnp.float32),
        scm=jnp.asarray(scm, jnp.float32),
    )


# ---------------------------------------------------------------------------
# Pure-JAX reference (mirrors the PyTorch forward) for verification
# ---------------------------------------------------------------------------
def reference(x, P):
    bs, C, H, W = x.shape
    dn = ("NCHW", "OIHW", "NCHW")
    bcast = lambda a: a[None, :, None, None]

    k1 = lax.conv_general_dilated(x, P["wk_g"], (1, 1), "SAME",
                                  feature_group_count=P["groups"],
                                  dimension_numbers=dn)
    k1 = jnp.maximum(k1 * bcast(P["k_scale"]) + bcast(P["k_shift"]), 0.0)

    v = lax.conv_general_dilated(x, P["wv_oihw"], (1, 1), "VALID", dimension_numbers=dn)
    v = (v * bcast(P["v_scale"]) + bcast(P["v_shift"])).reshape(bs, C, -1)

    y = jnp.concatenate([k1, x], axis=1)
    h1 = lax.conv_general_dilated(y, P["wa1_oihw"], (1, 1), "VALID", dimension_numbers=dn)
    h1 = jnp.maximum(h1 * bcast(P["a1_scale"]) + bcast(P["a1_shift"]), 0.0)
    att = lax.conv_general_dilated(h1, P["wa2_oihw"], (1, 1), "VALID", dimension_numbers=dn)
    att = att + P["a2_bias"][None, :, None, None]
    att = att.reshape(bs, C, P["ksize"] * P["ksize"], H, W).mean(2).reshape(bs, C, -1)

    k2 = (jax.nn.softmax(att, axis=-1) * v).reshape(bs, C, H, W)
    return k1 + k2


if __name__ == "__main__":
    key = jax.random.PRNGKey(0)
    kx, kp = jax.random.split(key)

    bs, C, H, W = 2, 16, 16, 16        # C divisible by groups=4; HW=256 (lane-dense)
    x = jax.random.normal(kx, (bs, C, H, W), jnp.float32)
    params = make_params(kp, C=C)

    out = jax.block_until_ready(cot_attention_pallas(x, params))

    ref = reference(x, params)
    assert out.shape == (bs, C, H, W)
    err = float(jnp.max(jnp.abs(out - ref)))
    # tolerance accounts for bf16 MXU operands + approx reciprocal in the softmax
    assert jnp.allclose(out, ref, atol=2e-2, rtol=2e-2), err

    print("KERNEL_OK")
</pallas_src>

<mosaic_0001>
module attributes {stable_mosaic.version = 11 : i64} {
  func.func @kernel(%arg0: i32, %arg1: memref<1x16x256xf32, #tpu.memory_space<vmem>>, %arg2: memref<40x144xbf16, #tpu.memory_space<vmem>>, %arg3: memref<8x16xbf16, #tpu.memory_space<vmem>>, %arg4: memref<16x8xbf16, #tpu.memory_space<vmem>>, %arg5: memref<9x256xf32, #tpu.memory_space<vmem>>, %arg6: memref<16x5xf32, #tpu.memory_space<vmem>>, %arg7: memref<8x2xf32, #tpu.memory_space<vmem>>, %arg8: memref<1x16x256xf32, #tpu.memory_space<vmem>>) attributes {dimension_semantics = [#tpu.dimension_semantics<parallel>], iteration_bounds = array<i64: 2>, scalar_prefetch = 0 : i64, scratch_operands = 0 : i64, tpu.core_type = #tpu.core_type<tc>, window_params = [{transform_indices = @transform_0, window_bounds = array<i64: 1, 16, 256>}, {pipeline_mode = #tpu.pipeline_mode<synchronous>, transform_indices = @transform_1, window_bounds = array<i64: 40, 144>}, {pipeline_mode = #tpu.pipeline_mode<synchronous>, transform_indices = @transform_2, window_bounds = array<i64: 8, 16>}, {pipeline_mode = #tpu.pipeline_mode<synchronous>, transform_indices = @transform_3, window_bounds = array<i64: 16, 8>}, {pipeline_mode = #tpu.pipeline_mode<synchronous>, transform_indices = @transform_4, window_bounds = array<i64: 9, 256>}, {pipeline_mode = #tpu.pipeline_mode<synchronous>, transform_indices = @transform_5, window_bounds = array<i64: 16, 5>}, {pipeline_mode = #tpu.pipeline_mode<synchronous>, transform_indices = @transform_6, window_bounds = array<i64: 8, 2>}, {transform_indices = @transform_7, window_bounds = array<i64: 1, 16, 256>}]} {
    %c0 = arith.constant 0 : index
    %c0_0 = arith.constant 0 : index
    %c0_1 = arith.constant 0 : index
    %0 = vector.load %arg1[%c0, %c0_0, %c0_1] : memref<1x16x256xf32, #tpu.memory_space<vmem>>, vector<1x16x256xf32>
    %1 = vector.shape_cast %0 : vector<1x16x256xf32> to vector<16x256xf32>
    %c17_i32 = arith.constant 17 : i32
    %2 = tpu.dynamic_rotate %1 by %c17_i32 dim 1 : vector<16x256xf32>, i32 -> vector<16x256xf32>
    %c0_2 = arith.constant 0 : index
    %c0_3 = arith.constant 0 : index
    %3 = vector.load %arg5[%c0_2, %c0_3] : memref<9x256xf32, #tpu.memory_space<vmem>>, vector<1x256xf32>
    %4 = vector.broadcast %3 : vector<1x256xf32> to vector<16x256xf32>
    %5 = arith.mulf %2, %4 : vector<16x256xf32>
    %c16_i32 = arith.constant 16 : i32
    %6 = tpu.dynamic_rotate %1 by %c16_i32 dim 1 : vector<16x256xf32>, i32 -> vector<16x256xf32>
    %c1 = arith.constant 1 : index
    %c0_4 = arith.constant 0 : index
    %7 = vector.load %arg5[%c1, %c0_4] : memref<9x256xf32, #tpu.memory_space<vmem>>, vector<1x256xf32>
    %8 = vector.broadcast %7 : vector<1x256xf32> to vector<16x256xf32>
    %9 = arith.mulf %6, %8 : vector<16x256xf32>
    %c15_i32 = arith.constant 15 : i32
    %10 = tpu.dynamic_rotate %1 by %c15_i32 dim 1 : vector<16x256xf32>, i32 -> vector<16x256xf32>
    %c2 = arith.constant 2 : index
    %c0_5 = arith.constant 0 : index
    %11 = vector.load %arg5[%c2, %c0_5] : memref<9x256xf32, #tpu.memory_space<vmem>>, vector<1x256xf32>
    %12 = vector.broadcast %11 : vector<1x256xf32> to vector<16x256xf32>
    %13 = arith.mulf %10, %12 : vector<16x256xf32>
    %c1_i32 = arith.constant 1 : i32
    %14 = tpu.dynamic_rotate %1 by %c1_i32 dim 1 : vector<16x256xf32>, i32 -> vector<16x256xf32>
    %c3 = arith.constant 3 : index
    %c0_6 = arith.constant 0 : index
    %15 = vector.load %arg5[%c3, %c0_6] : memref<9x256xf32, #tpu.memory_space<vmem>>, vector<1x256xf32>
    %16 = vector.broadcast %15 : vector<1x256xf32> to vector<16x256xf32>
    %17 = arith.mulf %14, %16 : vector<16x256xf32>
    %c255_i32 = arith.constant 255 : i32
    %18 = tpu.dynamic_rotate %1 by %c255_i32 dim 1 : vector<16x256xf32>, i32 -> vector<16x256xf32>
    %c5 = arith.constant 5 : index
    %c0_7 = arith.constant 0 : index
    %19 = vector.load %arg5[%c5, %c0_7] : memref<9x256xf32, #tpu.memory_space<vmem>>, vector<1x256xf32>
    %20 = vector.broadcast %19 : vector<1x256xf32> to vector<16x256xf32>
    %21 = arith.mulf %18, %20 : vector<16x256xf32>
    %c241_i32 = arith.constant 241 : i32
    %22 = tpu.dynamic_rotate %1 by %c241_i32 dim 1 : vector<16x256xf32>, i32 -> vector<16x256xf32>
    %c6 = arith.constant 6 : index
    %c0_8 = arith.constant 0 : index
    %23 = vector.load %arg5[%c6, %c0_8] : memref<9x256xf32, #tpu.memory_space<vmem>>, vector<1x256xf32>
    %24 = vector.broadcast %23 : vector<1x256xf32> to vector<16x256xf32>
    %25 = arith.mulf %22, %24 : vector<16x256xf32>
    %c240_i32 = arith.constant 240 : i32
    %26 = tpu.dynamic_rotate %1 by %c240_i32 dim 1 : vector<16x256xf32>, i32 -> vector<16x256xf32>
    %c7 = arith.constant 7 : index
    %c0_9 = arith.constant 0 : index
    %27 = vector.load %arg5[%c7, %c0_9] : memref<9x256xf32, #tpu.memory_space<vmem>>, vector<1x256xf32>
    %28 = vector.broadcast %27 : vector<1x256xf32> to vector<16x256xf32>
    %29 = arith.mulf %26, %28 : vector<16x256xf32>
    %c239_i32 = arith.constant 239 : i32
    %30 = tpu.dynamic_rotate %1 by %c239_i32 dim 1 : vector<16x256xf32>, i32 -> vector<16x256xf32>
    %c8 = arith.constant 8 : index
    %c0_10 = arith.constant 0 : index
    %31 = vector.load %arg5[%c8, %c0_10] : memref<9x256xf32, #tpu.memory_space<vmem>>, vector<1x256xf32>
    %32 = vector.broadcast %31 : vector<1x256xf32> to vector<16x256xf32>
    %33 = arith.mulf %30, %32 : vector<16x256xf32>
    %34 = tpu.concatenate %5, %9, %13, %17, %1, %21, %25, %29, %33 in 0 : vector<16x256xf32>, vector<16x256xf32>, vector<16x256xf32>, vector<16x256xf32>, vector<16x256xf32>, vector<16x256xf32>, vector<16x256xf32>, vector<16x256xf32>, vector<16x256xf32> -> vector<144x256xf32>
    %35 = arith.truncf %34 : vector<144x256xf32> to vector<144x256xbf16>
    %c0_11 = arith.constant 0 : index
    %c0_12 = arith.constant 0 : index
    %36 = vector.load %arg2[%c0_11, %c0_12] : memref<40x144xbf16, #tpu.memory_space<vmem>>, vector<40x144xbf16>
    %cst = arith.constant dense<0.000000e+00> : vector<40x256xf32>
    %37 = tpu.matmul %36, %35, %cst {dimension_numbers = #tpu.dot_dimension_numbers<[1], [0], [0], [1], [0, 0, 1, 1], [], []>} : vector<40x144xbf16>, vector<144x256xbf16>, vector<40x256xf32> -> vector<40x256xf32>
    %c0_13 = arith.constant 0 : index
    %c0_14 = arith.constant 0 : index
    %38 = vector.load %arg6[%c0_13, %c0_14] : memref<16x5xf32, #tpu.memory_space<vmem>>, vector<16x1xf32>
    %c0_15 = arith.constant 0 : index
    %c1_16 = arith.constant 1 : index
    %39 = vector.load %arg6[%c0_15, %c1_16] : memref<16x5xf32, #tpu.memory_space<vmem>>, vector<16x1xf32>
    %c0_17 = arith.constant 0 : index
    %c2_18 = arith.constant 2 : index
    %40 = vector.load %arg6[%c0_17, %c2_18] : memref<16x5xf32, #tpu.memory_space<vmem>>, vector<16x1xf32>
    %c0_19 = arith.constant 0 : index
    %c3_20 = arith.constant 3 : index
    %41 = vector.load %arg6[%c0_19, %c3_20] : memref<16x5xf32, #tpu.memory_space<vmem>>, vector<16x1xf32>
    %c0_21 = arith.constant 0 : index
    %c4 = arith.constant 4 : index
    %42 = vector.load %arg6[%c0_21, %c4] : memref<16x5xf32, #tpu.memory_space<vmem>>, vector<16x1xf32>
    %c0_22 = arith.constant 0 : index
    %c0_23 = arith.constant 0 : index
    %43 = vector.load %arg7[%c0_22, %c0_23] : memref<8x2xf32, #tpu.memory_space<vmem>>, vector<8x1xf32>
    %c0_24 = arith.constant 0 : index
    %c1_25 = arith.constant 1 : index
    %44 = vector.load %arg7[%c0_24, %c1_25] : memref<8x2xf32, #tpu.memory_space<vmem>>, vector<8x1xf32>
    %45 = vector.extract_strided_slice %37 {offsets = [0, 0], sizes = [16, 256], strides = [1, 1]} : vector<40x256xf32> to vector<16x256xf32>
    %46 = vector.broadcast %38 : vector<16x1xf32> to vector<16x256xf32>
    %47 = arith.mulf %45, %46 : vector<16x256xf32>
    %48 = vector.broadcast %39 : vector<16x1xf32> to vector<16x256xf32>
    %49 = arith.addf %47, %48 : vector<16x256xf32>
    %cst_26 = arith.constant 0.000000e+00 : f32
    %50 = vector.broadcast %cst_26 : f32 to vector<16x256xf32>
    %51 = arith.maximumf %49, %50 : vector<16x256xf32>
    %52 = vector.extract_strided_slice %37 {offsets = [16, 0], sizes = [16, 256], strides = [1, 1]} : vector<40x256xf32> to vector<16x256xf32>
    %53 = vector.broadcast %40 : vector<16x1xf32> to vector<16x256xf32>
    %54 = arith.mulf %52, %53 : vector<16x256xf32>
    %55 = vector.broadcast %41 : vector<16x1xf32> to vector<16x256xf32>
    %56 = arith.addf %54, %55 : vector<16x256xf32>
    %c0_27 = arith.constant 0 : index
    %c0_28 = arith.constant 0 : index
    %57 = vector.load %arg3[%c0_27, %c0_28] : memref<8x16xbf16, #tpu.memory_space<vmem>>, vector<8x16xbf16>
    %58 = arith.truncf %51 : vector<16x256xf32> to vector<16x256xbf16>
    %cst_29 = arith.constant dense<0.000000e+00> : vector<8x256xf32>
    %59 = tpu.matmul %57, %58, %cst_29 {dimension_numbers = #tpu.dot_dimension_numbers<[1], [0], [0], [1], [0, 0, 1, 1], [], []>} : vector<8x16xbf16>, vector<16x256xbf16>, vector<8x256xf32> -> vector<8x256xf32>
    %60 = vector.extract_strided_slice %37 {offsets = [32, 0], sizes = [8, 256], strides = [1, 1]} : vector<40x256xf32> to vector<8x256xf32>
    %61 = arith.addf %59, %60 : vector<8x256xf32>
    %62 = vector.broadcast %43 : vector<8x1xf32> to vector<8x256xf32>
    %63 = arith.mulf %61, %62 : vector<8x256xf32>
    %64 = vector.broadcast %44 : vector<8x1xf32> to vector<8x256xf32>
    %65 = arith.addf %63, %64 : vector<8x256xf32>
    %cst_30 = arith.constant 0.000000e+00 : f32
    %66 = vector.broadcast %cst_30 : f32 to vector<8x256xf32>
    %67 = arith.maximumf %65, %66 : vector<8x256xf32>
    %c0_31 = arith.constant 0 : index
    %c0_32 = arith.constant 0 : index
    %68 = vector.load %arg4[%c0_31, %c0_32] : memref<16x8xbf16, #tpu.memory_space<vmem>>, vector<16x8xbf16>
    %69 = arith.truncf %67 : vector<8x256xf32> to vector<8x256xbf16>
    %cst_33 = arith.constant dense<0.000000e+00> : vector<16x256xf32>
    %70 = tpu.matmul %68, %69, %cst_33 {dimension_numbers = #tpu.dot_dimension_numbers<[1], [0], [0], [1], [0, 0, 1, 1], [], []>} : vector<16x8xbf16>, vector<8x256xbf16>, vector<16x256xf32> -> vector<16x256xf32>
    %71 = vector.broadcast %42 : vector<16x1xf32> to vector<16x256xf32>
    %72 = arith.addf %70, %71 : vector<16x256xf32>
    %cst_34 = arith.constant dense<0xFF800000> : vector<16xf32>
    %73 = vector.multi_reduction <maximumf>, %72, %cst_34 [1] : vector<16x256xf32> to vector<16xf32>
    %74 = vector.shape_cast %73 : vector<16xf32> to vector<16x1xf32>
    %75 = vector.broadcast %74 : vector<16x1xf32> to vector<16x256xf32>
    %76 = arith.subf %72, %75 : vector<16x256xf32>
    %77 = math.exp %76 : vector<16x256xf32>
    %cst_35 = arith.constant dense<0.000000e+00> : vector<16xf32>
    %78 = vector.multi_reduction <add>, %77, %cst_35 [1] : vector<16x256xf32> to vector<16xf32>
    %79 = vector.shape_cast %78 : vector<16xf32> to vector<16x1xf32>
    %80 = tpu.reciprocal %79 {approx = true} : vector<16x1xf32> -> vector<16x1xf32>
    %81 = vector.broadcast %80 : vector<16x1xf32> to vector<16x256xf32>
    %82 = arith.mulf %77, %81 : vector<16x256xf32>
    %83 = arith.mulf %82, %56 : vector<16x256xf32>
    %84 = arith.addf %51, %83 : vector<16x256xf32>
    %c0_36 = arith.constant 0 : index
    %c0_37 = arith.constant 0 : index
    %c0_38 = arith.constant 0 : index
    %85 = vector.load %arg8[%c0_36, %c0_37, %c0_38] : memref<1x16x256xf32, #tpu.memory_space<vmem>>, vector<1x16x256xf32>
    %86 = vector.shape_cast %85 : vector<1x16x256xf32> to vector<16x256xf32>
    %87 = vector.shape_cast %84 : vector<16x256xf32> to vector<1x16x256xf32>
    tpu.vector_store %arg8[%c0_36, %c0_37, %c0_38], %87 {strides = array<i32>} : memref<1x16x256xf32, #tpu.memory_space<vmem>>, vector<1x16x256xf32>,
    return
  }
  func.func @transform_0(%arg0: i32) -> (i32, i32, i32) {
    %c0_i32 = arith.constant 0 : i32
    %c0_i32_0 = arith.constant 0 : i32
    %c0_i32_1 = arith.constant 0 : i32
    return %arg0, %c0_i32, %c0_i32_0 : i32, i32, i32
  }
  func.func @transform_1(%arg0: i32) -> (i32, i32) {
    %c0_i32 = arith.constant 0 : i32
    %c0_i32_0 = arith.constant 0 : i32
    %c0_i32_1 = arith.constant 0 : i32
    return %c0_i32, %c0_i32_0 : i32, i32
  }
  func.func @transform_2(%arg0: i32) -> (i32, i32) {
    %c0_i32 = arith.constant 0 : i32
    %c0_i32_0 = arith.constant 0 : i32
    %c0_i32_1 = arith.constant 0 : i32
    return %c0_i32, %c0_i32_0 : i32, i32
  }
  func.func @transform_3(%arg0: i32) -> (i32, i32) {
    %c0_i32 = arith.constant 0 : i32
    %c0_i32_0 = arith.constant 0 : i32
    %c0_i32_1 = arith.constant 0 : i32
    return %c0_i32, %c0_i32_0 : i32, i32
  }
  func.func @transform_4(%arg0: i32) -> (i32, i32) {
    %c0_i32 = arith.constant 0 : i32
    %c0_i32_0 = arith.constant 0 : i32
    %c0_i32_1 = arith.constant 0 : i32
    return %c0_i32, %c0_i32_0 : i32, i32
  }
  func.func @transform_5(%arg0: i32) -> (i32, i32) {
    %c0_i32 = arith.constant 0 : i32
    %c0_i32_0 = arith.constant 0 : i32
    %c0_i32_1 = arith.constant 0 : i32
    return %c0_i32, %c0_i32_0 : i32, i32
  }
  func.func @transform_6(%arg0: i32) -> (i32, i32) {
    %c0_i32 = arith.constant 0 : i32
    %c0_i32_0 = arith.constant 0 : i32
    %c0_i32_1 = arith.constant 0 : i32
    return %c0_i32, %c0_i32_0 : i32, i32
  }
  func.func @transform_7(%arg0: i32) -> (i32, i32, i32) {
    %c0_i32 = arith.constant 0 : i32
    %c0_i32_0 = arith.constant 0 : i32
    %c0_i32_1 = arith.constant 0 : i32
    return %arg0, %c0_i32, %c0_i32_0 : i32, i32, i32
  }
}

</mosaic_0001>

<bundles_post_ra>
// kernel: tpu_custom_call.1
= control target key start
LH: loop header
LB: loop body
LE: loop exit
PB: predicated region body
PF: predicated region fallthrough
CT: control target
= control target key end

     0   :  { %s1623_s0 = inlined_call_operand.hbm [shape: f32[2,16,256], index: 0, kind: input, shape index: {}]   ;;  %s1624_s1 = inlined_call_operand.hbm [shape: bf16[40,144], index: 1, kind: input, shape index: {}]   ;;  %s1625_s2 = inlined_call_operand.vmem [shape: bf16[8,16], index: 2, kind: input, shape index: {}]   ;;  %s1626_s3 = inlined_call_operand.vmem [shape: bf16[16,8], index: 3, kind: input, shape index: {}]   ;;  %s1627_s4 = inlined_call_operand.vmem [shape: f32[9,256], index: 4, kind: input, shape index: {}]   ;;  %s1628_s5 = inlined_call_operand.vmem [shape: f32[16,5], index: 5, kind: input, shape index: {}]   ;;  %s1629_s6 = inlined_call_operand.vmem [shape: f32[8,2], index: 6, kind: input, shape index: {}]   ;;  %s1630_s7 = inlined_call_operand.hbm [shape: f32[2,16,256], index: 7, kind: output, shape index: {}]  }
   0x1   :  { %1631 = sst [smem:[#allocation11_spill]] %s1624_s1 }
   0x2   :  { %12 = vsyncpa [#allocation3], 0 }
   0x3   :  { %14 = vsyncpa [#allocation3 + $0x1], 0 }
   0x4   :  { %15 = vsyncpa [#allocation6], 0 }
   0x5   :  { %16 = vsyncpa [#allocation4], 0 }
   0x6   :  { %18 = vsyncpa [#allocation4 + $0x1], 0  ;;  %s1314_s24 = smov 0   ;;  %s1316_s25 = smov 0  }
   0x7   :  { %s1318_s26 = smov 0   ;;  %s1320_s27 = smov 0  }
   0x8 LB: > { %s1335_s28 = sadd.s32 4294967295, %s1253_s27   ;;  %s964_s29 = sadd.s32 4294967294, %s1253_s27   ;;  %s1253_s27 = sphi %s1320_s27, %s1642_s27   ;;  %s1249_s26 = sphi %s1318_s26, %s1641_s26   ;;  %s1245_s25 = sphi %s1316_s25, %s1640_s25   ;;  %s1241_s24 = sphi %s1314_s24, %s1639_s24  }
   0x9   : > { %p44_p0 = scmp.ne.s32.totalorder %s1245_s25, %s1241_s24  ;;  %p45_p1 = scmp.eq.s32.totalorder %s1335_s28, 0 }
   0xa   : > { %p194_p2 = scmp.eq.s32.totalorder %s1335_s28, 1  ;;  %p200_p3 = scmp.eq.s32.totalorder %s964_s29, 1 }
   0xb   : > { %p1344_p4 = por %p45_p1, %p44_p0  ;;  %p965_p5 = scmp.ge.s32.totalorder %s1253_s27, 1 }
   0xc   : > { %p1349_p6 = por %p200_p3, %p44_p0  ;;  %p207_p7 = scmp.lt.s32.totalorder %s1253_s27, 3 }
   0xd   : > { %s1634_s1 = sld [smem:[#allocation11_spill]]  ;;  %s1255_s13 = smov [#allocation5]  }
   0xe   : > { %p1357_p8 = pnand %p965_p5, %p207_p7  ;;  %s220_s14 = sshll.u32 %s1255_s13, 4  ;;  %s221_s14 = int_to_ptr.vmem [resolvable:$true] %s220_s14 }
   0xf   : > { %s1367_s15 = sadd.s32 1, %s1253_s27   ;;  %s1256_s16 = smov 128  }
  0x10   : > { %p1032_p9 = pneg %p1357_p8  ;;  %s1257_s17 = smov 8  }
  0x11   : > { %s28_s18 = ssub.s32 %s1253_s27, %s1367_s15  ;;  %s31_s19 = sadd.s32 1, %s1249_s26 }
  0x12   : > { %p1033_p10 = pnand %p1032_p9, %p45_p1  ;;  %p29_p12 = scmp.eq.s32.totalorder %s28_s18, 0 }
  0x13   : > { %s218_s11 = sshll.u32 %s1634_s1, 4  ;;  %p38_p13 = scmp.ne.s32.totalorder %s1249_s26, %s1245_s25  ;;  %s219_s11 = int_to_ptr.hbm [resolvable:$true] %s218_s11 }
  0x14   : > { %1035 = dma.hbm_to_vmem [thread:$0]  (!%p1033_p10), %s219_s11, 640, %s221_s14, [#allocation6], %s1256_s16, %s1256_s16, %s1257_s17  }
  0x15   : > { %p39_p0 = scmp.eq.s32.totalorder %s1253_s27, 0  ;;  %p1045_p3 = scmp.lt.s32.totalorder %s1253_s27, 2 }
  0x16   : > { %s1377_s20 = scalar_select %p29_p12, %s1249_s26, %s31_s19  }
  0x17   : > { %p40_p5 = por %p39_p0, %p38_p13  ;;  %p1381_p7 = por %p194_p2, %p38_p13 }
  0x18   : > { %s249_s22 = sand.u32 1, %s1249_s26   ;;  %s1017_s23 = sshll.u32 %s1253_s27, 5 }
  0x19   : > { %s968_s29 = sshll.u32 %s249_s22, 5  ;;  %s258_s11 = scalar_lea.hbm %s1623_s0, %s1017_s23 }
  0x1a   : > { %s259_s13 = sshll.u32 %s258_s11, 4  ;;  %s253_s14 = scalar_lea.vmem [#allocation2], %s968_s29  ;;  %s260_s13 = int_to_ptr.hbm [resolvable:$true] %s259_s13 }
  0x1b   : > { %s261_s16 = sshll.u32 %s253_s14, 4  ;;  %p1392_p9 = pnand %p1045_p3, %p40_p5  ;;  %s262_s16 = int_to_ptr.vmem [resolvable:$true] %s261_s16 }
  0x1c   : > { %s250_s18 = scalar_lea.sflag [#allocation3], %s249_s22  ;;  %s1153_s19 = sshra.s32 %s260_s13, 4  ;;  %s1154_s19 = int_to_ptr.hbm [resolvable:$true] %s1153_s19 }
  0x1d   : > { %s1155_s1 = scalar_lea.hbm %s1154_s19, 32  ;;  %p1157_p10 = pneg %p1392_p9 }
  0x1e   : > { %p1156_p2 = scmp.ne.s32.totalorder %s1154_s19, %s1155_s1  ;;  %s1160_s9 = scalar_lea.hbm %s1623_s0, 64 }
  0x1f   : > { %p1161_p0 = scmp.lt.s32.totalorder %s1154_s19, %s1623_s0  ;;  %p1162_p3 = scmp.lt.s32.totalorder %s1160_s9, %s1155_s1 }
  0x20   : > { %p1158_p12 = pnand %p1157_p10, %p1156_p2 }
  0x21   : > { %p1163_p5 = por %p1162_p3, %p1161_p0 }
  0x22   : > { %p1159_p13 = pneg %p1158_p12 }
  0x24   : > { %p1164_p11 = pnand %p1163_p5, %p1159_p13 }
  0x26   : > { %1167 = shalt.err (!%p1164_p11)
}
  0x27   : > { %s1258_s22 = smov 256   ;;  %s1259_s14 = smov 16  }
  0x28   : > { %1039 = dma.hbm_to_vmem [thread:$0]  (!%p1392_p9), %s260_s13, 512, %s262_s16, %s250_s18, %s1258_s22, %s1258_s22, %s1259_s14  }
  0x29   : > { %273 = sbr.rel (%p1357_p8) target bundleno = 964 (0x3c4), region = 48  ;;  %s1409_s23 = sand.u32 (!%p1357_p8), 1, %s1245_s25  }
  0x2a   : > { %s972_s19 = sshll.u32 (!%p1357_p8), %s1409_s23, 5  ;;  %s276_s1 = scalar_lea.sflag (!%p1357_p8), [#allocation3], %s1409_s23 }
  0x2b   : > { %s279_s29 = scalar_lea.vmem (!%p1357_p8), [#allocation2], %s972_s19 }
  0x2e   : > { %1228 = dma.done.wait (%p1344_p4), %s276_s1, 512  }
  0x2f   : > { %1230 = vsyncadd (%p1344_p4), %s276_s1, 4294966784 }
  0x30   : > { %1232 = dma.done.wait (%p45_p1), [#allocation6], 640  }
  0x31   : > { %1234 = vsyncadd (%p45_p1), [#allocation6], 4294966656  ;;  %v1423_v0 = vld [vmem:[%s279_s29 + $0x8] sm:$0xff]  ;;  %v1425_v1 = vld [vmem:[%s279_s29] sm:$0xff]  ;;  %s1260_s12 = smov 112   ;;  %s1261_s13 = smov 113   ;;  %v329_v6 = vlaneseq }
  0x32   : > { %470 = vrot.lane.b32.xlu1 %v1423_v0, %s1260_s12  ;;  %466 = vrot.lane.b32.xlu0 %v1425_v1, %s1260_s12  ;;  %v1430_v2 = vld [vmem:[%s279_s29 + $0x18] sm:$0xff]  ;;  %v1432_v3 = vld [vmem:[%s279_s29 + $0x10] sm:$0xff]  ;;  %s1262_s30 = smov 127   ;;  %s1263_s16 = smov 1   ;;  %vm561_vm8 = vcmask 130048   ;;  %vm788_vm9 = vcmask 1043456  }
  0x33   : > { %442 = vrot.lane.b32.xlu2 %v1425_v1, %s1261_s13  ;;  %s1264_s17 = smov 15   ;;  %s1265_s18 = smov 16   ;;  %v1467_v8 = vand.u32 127, %v329_v6  ;;  %v980_v10 = vld [vmem:[%s1627_s4 + $0x7] ss:$8 sm:$0x3]  ;;  %v522_v58 = vpack.c.bf16 %v1432_v3, %v1425_v1  ;;  %v523_v59 = vpack.c.bf16 %v1430_v2, %v1423_v0 }
  0x34   : > { %s1266_s9 = smov 17   ;;  %s1267_s10 = smov 111   ;;  %v482_v12 = vperm.slane %v980_v10, 0  ;;  %v483_v13 = vperm.slane %v980_v10, 1  ;;  %vm784_vm10 = vcmask 64512  }
  0x35   : > { %vm474_vm0 = vcmp.lt.s32.totalorder %v1467_v8, 112  ;;  %v979_v24 = vld [vmem:[%s1627_s4 + $0x6] ss:$8 sm:$0x3]  ;;  %vm450_vm1 = vcmp.lt.s32.totalorder %v1467_v8, 113  ;;  %vm426_vm2 = vcmp.lt.s32.totalorder %v1467_v8, 127 }
  0x36   : > { %v458_v28 = vperm.slane %v979_v24, 0  ;;  %v459_v29 = vperm.slane %v979_v24, 1  ;;  %v978_v40 = vld [vmem:[%s1627_s4 + $0x5] ss:$8 sm:$0x3]  ;;  %vm402_vm3 = vcmp.lt.s32.totalorder %v1467_v8, 1 }
  0x37   : > { %v434_v43 = vperm.slane %v978_v40, 0  ;;  %v435_v44 = vperm.slane %v978_v40, 1  ;;  %v977_v63 = vld [vmem:[%s1627_s4 + $0x3] ss:$8 sm:$0x3]  ;;  %vm378_vm4 = vcmp.lt.s32.totalorder %v1467_v8, 15 }
  0x38   : > { %vm354_vm5 = vcmp.lt.s32.totalorder %v1467_v8, 16  ;;  %vm331_vm6 = vcmp.lt.s32.totalorder %v1467_v8, 17  ;;  %vm498_vm7 = vcmp.lt.s32.totalorder %v1467_v8, 111  ;;  %s1023_s14 = sshll.u32 %s1335_s28, 5  ;;  %s315_s28 = scalar_lea.vmem [#allocation7], %s972_s19 }
  0x39   : > { %s866_s19 = scalar_lea.sflag [#allocation4], %s1409_s23  ;;  %s1203_s11 = scalar_lea.hbm %s1630_s7, 64 }
  0x3a   : > { %472 = vrot.lane.b32.xlu1 %v1430_v2, %s1260_s12  ;;  %468 = vrot.lane.b32.xlu0 %v1432_v3, %s1260_s12  ;;  %s877_s12 = scalar_lea.hbm %s1630_s7, %s1023_s14 }
  0x3b   : > { %444 = vrot.lane.b32.xlu2 %v1432_v3, %s1261_s13 }
  0x42   : > { %448 = vrot.lane.b32.xlu1 %v1430_v2, %s1261_s13  ;;  %446 = vrot.lane.b32.xlu0 %v1423_v0, %s1261_s13  ;;  %s878_s13 = sshll.u32 %s315_s28, 4  ;;  %s879_s13 = int_to_ptr.vmem [resolvable:$true] %s878_s13 }
  0x43   : > { %418 = vrot.lane.b32.xlu2 %v1425_v1, %s1262_s30 }
  0x4a   : > { %422 = vrot.lane.b32.xlu1 %v1423_v0, %s1262_s30  ;;  %420 = vrot.lane.b32.xlu0 %v1432_v3, %s1262_s30 }
  0x4b   : > { %424 = vrot.lane.b32.xlu2 %v1430_v2, %s1262_s30  ;;  %s880_s30 = sshll.u32 %s877_s12, 4  ;;  %s881_s30 = int_to_ptr.hbm [resolvable:$true] %s880_s30 }
  0x52   : > { %396 = vrot.lane.b32.xlu1 %v1432_v3, %s1263_s16  ;;  %394 = vrot.lane.b32.xlu0 %v1425_v1, %s1263_s16 }
  0x53   : > { %398 = vrot.lane.b32.xlu2 %v1423_v0, %s1263_s16 }
  0x5a   : > { %370 = vrot.lane.b32.xlu1 %v1425_v1, %s1264_s17  ;;  %400 = vrot.lane.b32.xlu0 %v1430_v2, %s1263_s16  ;;  %s1197_s16 = sshra.s32 %s881_s30, 4  ;;  %s1198_s16 = int_to_ptr.hbm [resolvable:$true] %s1197_s16 }
  0x5b   : > { %372 = vrot.lane.b32.xlu2 %v1432_v3, %s1264_s17  ;;  %p1204_p11 = scmp.lt.s32.totalorder %s1198_s16, %s1630_s7 }
  0x62   : > { %376 = vrot.lane.b32.xlu1 %v1430_v2, %s1264_s17  ;;  %374 = vrot.lane.b32.xlu0 %v1423_v0, %s1264_s17  ;;  %s1199_s17 = scalar_lea.hbm %s1198_s16, 32 }
  0x63   : > { %346 = vrot.lane.b32.xlu2 %v1425_v1, %s1265_s18  ;;  %p1200_p1 = scmp.ne.s32.totalorder %s1198_s16, %s1199_s17  ;;  %p1205_p9 = scmp.lt.s32.totalorder %s1203_s11, %s1199_s17 }
  0x65   : > { %p1201_p4 = pnand %p1200_p1, %p1381_p7  ;;  %p1206_p2 = por %p1205_p9, %p1204_p11 }
  0x67   : > { %p1202_p8 = pneg %p1201_p4 }
  0x69   : > { %p1207_p10 = pnand %p1206_p2, %p1202_p8 }
  0x6a   : > { %350 = vrot.lane.b32.xlu1 %v1423_v0, %s1265_s18  ;;  %348 = vrot.lane.b32.xlu0 %v1432_v3, %s1265_s18 }
  0x6b   : > { %352 = vrot.lane.b32.xlu2 %v1430_v2, %s1265_s18 }
  0x72   : > { %323 = vrot.lane.b32.xlu1 %v1432_v3, %s1266_s9  ;;  %321 = vrot.lane.b32.xlu0 %v1425_v1, %s1266_s9 }
  0x73   : > { %325 = vrot.lane.b32.xlu2 %v1423_v0, %s1266_s9 }
  0x7a   : > { %490 = vrot.lane.b32.xlu1 %v1425_v1, %s1267_s10  ;;  %327 = vrot.lane.b32.xlu0 %v1430_v2, %s1266_s9 }
  0x7b   : > { %492 = vrot.lane.b32.xlu2 %v1432_v3, %s1267_s10 }
  0x82   : > { %496 = vrot.lane.b32.xlu1 %v1430_v2, %s1267_s10  ;;  %494 = vrot.lane.b32.xlu0 %v1423_v0, %s1267_s10 }
  0x8d   : > { %v443_v4 = vpop.permute.xlu2 %442 }
  0x95   : > { %v445_v5 = vpop.permute.xlu2 %444 }
  0x9d   : > { %v419_v11 = vpop.permute.xlu2 %418 }
  0xa4   : > { %v471_v7 = vpop.permute.xlu1 %470  ;;  %v467_v9 = vpop.permute.xlu0 %466 }
  0xa5   : > { %v475_v14 = vsel %vm474_vm0, %v467_v9, %v471_v7  ;;  %v477_v15 = vsel %vm474_vm0, %v471_v7, %v467_v9  ;;  %v425_v27 = vpop.permute.xlu2 %424 }
  0xa6   : > { %v486_v20 = vmul.f32 %v482_v12, %v475_v14  ;;  %v487_v22 = vmul.f32 %v483_v13, %v477_v15 }
  0xac   : > { %v473_v16 = vpop.permute.xlu1 %472  ;;  %v469_v17 = vpop.permute.xlu0 %468 }
  0xad   : > { %v476_v18 = vsel %vm474_vm0, %v469_v17, %v473_v16  ;;  %v478_v19 = vsel %vm474_vm0, %v473_v16, %v469_v17  ;;  %v399_v45 = vpop.permute.xlu2 %398 }
  0xae   : > { %v488_v21 = vmul.f32 %v482_v12, %v476_v18  ;;  %v489_v23 = vmul.f32 %v483_v13, %v478_v19  ;;  %v976_v13 = vld [vmem:[%s1627_s4 + $0x2] ss:$8 sm:$0x3] }
  0xaf   : > { %v386_v17 = vperm.slane %v976_v13, 0  ;;  %v387_v18 = vperm.slane %v976_v13, 1 }
  0xb0   : > { %v528_v25 = vpack.c.bf16 %v488_v21, %v486_v20  ;;  %v529_v26 = vpack.c.bf16 %v489_v23, %v487_v22 }
  0xb2   : > { %571 = vmatpush.bf16.msra.mxu0 %v528_v25  ;;  %617 = vmatpush.bf16.msra.mxu2 %v529_v26 }
  0xb4   : > { %v449_v30 = vpop.permute.xlu1 %448  ;;  %v447_v31 = vpop.permute.xlu0 %446 }
  0xb5   : > { %v452_v32 = vsel %vm450_vm1, %v445_v5, %v449_v30  ;;  %v454_v33 = vsel %vm450_vm1, %v449_v30, %v445_v5  ;;  %v451_v34 = vsel %vm450_vm1, %v443_v4, %v447_v31  ;;  %v453_v35 = vsel %vm450_vm1, %v447_v31, %v443_v4  ;;  %v373_v62 = vpop.permute.xlu2 %372 }
  0xb6   : > { %v464_v36 = vmul.f32 %v458_v28, %v452_v32  ;;  %v465_v37 = vmul.f32 %v459_v29, %v454_v33  ;;  %v462_v38 = vmul.f32 %v458_v28, %v451_v34  ;;  %v463_v39 = vmul.f32 %v459_v29, %v453_v35  ;;  %v975_v29 = vld [vmem:[%s1627_s4 + $0x1] ss:$8 sm:$0x3] }
  0xb7   : > { %v410_v4 = vperm.slane %v977_v63, 0  ;;  %v411_v5 = vperm.slane %v977_v63, 1  ;;  %v362_v32 = vperm.slane %v975_v29, 0  ;;  %v363_v33 = vperm.slane %v975_v29, 1  ;;  %v994_v29 = vld [vmem:[#allocation5 + $0x18] sm:$0xf0] }
  0xb8   : > { %v526_v41 = vpack.c.bf16 %v464_v36, %v462_v38  ;;  %v527_v42 = vpack.c.bf16 %v465_v37, %v463_v39 }
  0xba   : > { %572 = vmatpush.bf16.msra.mxu0 %v526_v41  ;;  %618 = vmatpush.bf16.msra.mxu2 %v527_v42 }
  0xbc   : > { %v423_v46 = vpop.permute.xlu1 %422  ;;  %v421_v47 = vpop.permute.xlu0 %420 }
  0xbd   : > { %v427_v48 = vsel %vm426_vm2, %v419_v11, %v423_v46  ;;  %v429_v49 = vsel %vm426_vm2, %v423_v46, %v419_v11  ;;  %v428_v50 = vsel %vm426_vm2, %v421_v47, %v425_v27  ;;  %v430_v51 = vsel %vm426_vm2, %v425_v27, %v421_v47  ;;  %v347_v16 = vpop.permute.xlu2 %346  ;;  %v1505_v46 = vld [vmem:[%s1628_s5 + $0x8] sm:$0xff] }
  0xbe   : > { %v438_v52 = vmul.f32 %v434_v43, %v427_v48  ;;  %v439_v53 = vmul.f32 %v435_v44, %v429_v49  ;;  %v440_v54 = vmul.f32 %v434_v43, %v428_v50  ;;  %v441_v55 = vmul.f32 %v435_v44, %v430_v51 }
  0xbf   : > { %v1268_v49 = vmov 1   ;;  %v1269_v50 = vmov 0  }
  0xc0   : > { %v524_v56 = vpack.c.bf16 %v440_v54, %v438_v52  ;;  %v525_v57 = vpack.c.bf16 %v441_v55, %v439_v53  ;;  %1101 = vset.pattern.permute.xlu1 %v1268_v49  ;;  %1100 = vset.pattern.permute.xlu0 %v1269_v50  ;;  %v336_v53 = vld [vmem:[%s1627_s4] ss:$8 sm:$0x3] }
  0xc1   : > { %673 = vperm.xlu0 %1100, %v1505_v46   ;;  %1099 = vset.pattern.permute.xlu2 %v1269_v50  ;;  %v665_v55 = vld [vmem:[%s1629_s6] sm:$0xff] }
  0xc2   : > { %573 = vmatpush.bf16.msra.mxu0 %v524_v56  ;;  %619 = vmatpush.bf16.msra.mxu2 %v525_v57  ;;  %v338_v56 = vperm.slane %v336_v53, 0  ;;  %v339_v57 = vperm.slane %v336_v53, 1 }
  0xc4   : > { %v397_v60 = vpop.permute.xlu1 %396  ;;  %v395_v61 = vpop.permute.xlu0 %394 }
  0xc5   : > { %v403_v6 = vsel %vm402_vm3, %v395_v61, %v399_v45  ;;  %v405_v7 = vsel %vm402_vm3, %v399_v45, %v395_v61  ;;  %v353_v34 = vpop.permute.xlu2 %352  ;;  %v1500_v45 = vld [vmem:[%s1628_s5] sm:$0xff] }
  0xc6   : > { %574 = vmatpush.bf16.msra.mxu0 %v522_v58  ;;  %620 = vmatpush.bf16.msra.mxu2 %v523_v59  ;;  %v414_v0 = vmul.f32 %v410_v4, %v405_v7  ;;  %v415_v2 = vmul.f32 %v411_v5, %v403_v6 }
  0xc7   : > { %681 = vperm.xlu1 %1101, %v1500_v45   ;;  %668 = vperm.xlu2 %1099, %v1500_v45  }
  0xcc   : > { %v371_v9 = vpop.permute.xlu1 %370  ;;  %v401_v1 = vpop.permute.xlu0 %400 }
  0xcd   : > { %v404_v3 = vsel %vm402_vm3, %v397_v60, %v401_v1  ;;  %v406_v10 = vsel %vm402_vm3, %v401_v1, %v397_v60  ;;  %v326_v54 = vpop.permute.xlu2 %325  ;;  %v1019_v1 = vld [vmem:[#allocation5 + $0x4] sm:$0xf0] }
  0xce   : > { %v416_v11 = vmul.f32 %v410_v4, %v406_v10  ;;  %v417_v12 = vmul.f32 %v411_v5, %v404_v3  ;;  %v981_v3 = vld [vmem:[%s1627_s4 + $0x10] ss:$8 sm:$0x3] }
  0xcf   : > { %1103 = vset.pattern.permute.xlu1 %v1269_v50  ;;  %1102 = vset.pattern.permute.xlu2 %v1268_v49  ;;  %v507_v13 = vperm.slane %v981_v3, 1 }
  0xd0   : > { %v520_v14 = vpack.c.bf16 %v416_v11, %v414_v0  ;;  %v521_v15 = vpack.c.bf16 %v417_v12, %v415_v2  ;;  %754 = vperm.xlu1 %1103, %v665_v55   ;;  %685 = vperm.xlu2 %1102, %v1505_v46   ;;  %v506_v12 = vperm.slane %v981_v3, 0 }
  0xd2   : > { %575 = vmatpush.bf16.msra.mxu0 %v520_v14  ;;  %621 = vmatpush.bf16.msra.mxu2 %v521_v15 }
  0xd4   : > { %v377_v19 = vpop.permute.xlu1 %376  ;;  %v375_v20 = vpop.permute.xlu0 %374 }
  0xd5   : > { %v380_v21 = vsel %vm378_vm4, %v373_v62, %v377_v19  ;;  %v382_v22 = vsel %vm378_vm4, %v377_v19, %v373_v62  ;;  %v379_v23 = vsel %vm378_vm4, %v371_v9, %v375_v20  ;;  %v381_v24 = vsel %vm378_vm4, %v375_v20, %v371_v9  ;;  %v984_v9 = vld [vmem:[#allocation5] sm:$0xf]  ;;  %v493_v11 = vpop.permute.xlu2 %492 }
  0xd6   : > { %v392_v25 = vmul.f32 %v386_v17, %v382_v22  ;;  %v393_v26 = vmul.f32 %v387_v18, %v380_v21  ;;  %v390_v27 = vmul.f32 %v386_v17, %v381_v24  ;;  %v391_v28 = vmul.f32 %v387_v18, %v379_v23  ;;  %v1018_v24 = vld [vmem:[#allocation5 + $0x4] sm:$0xf] }
  0xd7   : > { %v985_v2 = vor.u32 %v1019_v1, %v984_v9 }
  0xd8   : > { %v518_v30 = vpack.c.bf16 %v392_v25, %v390_v27  ;;  %v519_v31 = vpack.c.bf16 %v393_v26, %v391_v28  ;;  %v986_v25 = vld [vmem:[#allocation5 + $0x8] sm:$0xf0]  ;;  %760 = vperm.xlu2 %1102, %v665_v55   ;;  %v1020_v28 = vld [vmem:[#allocation5 + $0x14] sm:$0xf] }
  0xd9   : > { %v989_v27 = vor.u32 %v1018_v24, %v986_v25 }
  0xda   : > { %576 = vmatpush.bf16.msra.mxu0 %v518_v30  ;;  %622 = vmatpush.bf16.msra.mxu2 %v519_v31  ;;  %v997_v30 = vor.u32 %v1020_v28, %v994_v29  ;;  %v992_v31 = vld [vmem:[#allocation5 + $0x10] sm:$0xf]  ;;  %v1270_v28 = vmov 4  }
  0xdb   : > { %1104 = vset.pattern.permute.xlu0 %v1270_v28  ;;  %1105 = vset.pattern.permute.xlu1 %v1270_v28 }
  0xdc   : > { %v351_v35 = vpop.permute.xlu1 %350  ;;  %v349_v36 = vpop.permute.xlu0 %348  ;;  %772 = vperm.xlu0 %1104, %v1500_v45   ;;  %776 = vperm.xlu1 %1105, %v1505_v46  }
  0xdd   : > { %v355_v37 = vsel %vm354_vm5, %v347_v16, %v351_v35  ;;  %v357_v38 = vsel %vm354_vm5, %v351_v35, %v347_v16  ;;  %v356_v39 = vsel %vm354_vm5, %v349_v36, %v353_v34  ;;  %v358_v40 = vsel %vm354_vm5, %v353_v34, %v349_v36  ;;  %v536_v34 = vld [vmem:[#allocation5 + $0x20] sm:$0xff] }
  0xde   : > { %v366_v41 = vmul.f32 %v362_v32, %v357_v38  ;;  %v367_v42 = vmul.f32 %v363_v33, %v355_v37  ;;  %v368_v43 = vmul.f32 %v362_v32, %v358_v40  ;;  %v369_v44 = vmul.f32 %v363_v33, %v356_v39  ;;  %v1021_v32 = vld [vmem:[#allocation5 + $0x14] sm:$0xf0] }
  0xdf   : > { %v993_v33 = vor.u32 %v1021_v32, %v992_v31  ;;  %v551_v35 = vunpack.c.h.b16 %v536_v34  ;;  %v550_v37 = vunpack.c.l.b16 %v536_v34 }
  0xe0   : > { %v516_v47 = vpack.c.bf16 %v368_v43, %v366_v41  ;;  %v517_v48 = vpack.c.bf16 %v369_v44, %v367_v42 }
  0xe1   : > { %v557_v36 = vpack.c.b16 %v551_v35, %v551_v35  ;;  %v556_v38 = vpack.c.b16 %v550_v37, %v550_v37 }
  0xe2   : > { %577 = vmatpush.bf16.msra.mxu0 %v516_v47  ;;  %623 = vmatpush.bf16.msra.mxu2 %v517_v48 }
  0xe4   : > { %v324_v51 = vpop.permute.xlu1 %323  ;;  %v322_v52 = vpop.permute.xlu0 %321 }
  0xe5   : > { %v332_v58 = vsel %vm331_vm6, %v322_v52, %v326_v54  ;;  %v334_v59 = vsel %vm331_vm6, %v326_v54, %v322_v52 }
  0xe6   : > { %v342_v4 = vmul.f32 %v338_v56, %v334_v59  ;;  %v343_v5 = vmul.f32 %v339_v57, %v332_v58 }
  0xec   : > { %v491_v60 = vpop.permute.xlu1 %490  ;;  %v328_v61 = vpop.permute.xlu0 %327 }
  0xed   : > { %v333_v62 = vsel %vm331_vm6, %v324_v51, %v328_v61  ;;  %v335_v63 = vsel %vm331_vm6, %v328_v61, %v324_v51 }
  0xee   : > { %v344_v6 = vmul.f32 %v338_v56, %v335_v63  ;;  %v345_v7 = vmul.f32 %v339_v57, %v333_v62 }
  0xf0   : > { %v514_v10 = vpack.c.bf16 %v344_v6, %v342_v4  ;;  %v515_v0 = vpack.c.bf16 %v345_v7, %v343_v5  ;;  %v720_v7 = vld [vmem:[%s1625_s2] sm:$0xf] }
  0xf2   : > { %578 = vmatpush.bf16.msra.mxu0 %v514_v10  ;;  %624 = vmatpush.bf16.msra.mxu2 %v515_v0 }
  0xf4   : > { %v497_v14 = vpop.permute.xlu1 %496  ;;  %v495_v15 = vpop.permute.xlu0 %494 }
  0xf5   : > { %v500_v16 = vsel %vm498_vm7, %v493_v11, %v497_v14  ;;  %v502_v17 = vsel %vm498_vm7, %v497_v14, %v493_v11  ;;  %v499_v18 = vsel %vm498_vm7, %v491_v60, %v495_v15  ;;  %v501_v19 = vsel %vm498_vm7, %v495_v15, %v491_v60  ;;  %625 = vmatmul.bf16.vlgmr.msra.gmra.mxu2 %v985_v2 }
  0xf6   : > { %v510_v20 = vmul.f32 %v506_v12, %v499_v18  ;;  %v512_v21 = vmul.f32 %v506_v12, %v500_v16  ;;  %v511_v22 = vmul.f32 %v507_v13, %v501_v19  ;;  %v513_v23 = vmul.f32 %v507_v13, %v502_v17  ;;  %579 = vmatmul.bf16.vlgmr.msra.gmra.mxu0 %v985_v2 }
  0xf8   : > { %v530_v26 = vpack.c.bf16 %v512_v21, %v510_v20  ;;  %v531_v8 = vpack.c.bf16 %v513_v23, %v511_v22 }
  0xfa   : > { %601 = vmatpush.bf16.msra.mxu1 %v530_v26  ;;  %647 = vmatpush.bf16.msra.mxu3 %v531_v8 }
  0xfd   : > { %998 = vmatmul.msk.bf16.vlgmr.msra.gmra.mxu1 %vm561_vm8, %v989_v27  ;;  %1001 = vmatmul.msk.bf16.vlgmr.msra.gmra.mxu3 %vm561_vm8, %v989_v27 }
 0x105   : > { %630 = vmatmul.bf16.gmra.mxu2 %v993_v33 }
 0x106   : > { %584 = vmatmul.bf16.gmra.mxu0 %v993_v33 }
 0x10d   : > { %999 = vmatmul.msk.bf16.gmra.mxu1 %vm561_vm8, %v997_v30  ;;  %1002 = vmatmul.msk.bf16.gmra.mxu3 %vm561_vm8, %v997_v30 }
 0x115   : > { %635 = vmatmul.bf16.gmra.mxu2 %v556_v38 }
 0x116   : > { %589 = vmatmul.bf16.gmra.mxu0 %v556_v38 }
 0x11d   : > { %1000 = vmatmul.msk.bf16.gmra.mxu1 %vm561_vm8, %v557_v36  ;;  %1003 = vmatmul.msk.bf16.gmra.mxu3 %vm561_vm8, %v557_v36 }
 0x121   : > { %v669_v42 = vpop.permute.xlu2 %668 }
 0x12a   : > { %v686_v56 = vpop.permute.xlu2 %685 }
 0x132   : > { %v761_v34 = vpop.permute.xlu2 %760 }
 0x133   : > { %v674_v51 = vpop.permute.xlu0 %673 }
 0x139   : > { %v682_v47 = vpop.permute.xlu1 %681 }
 0x142   : > { %v755_v31 = vpop.permute.xlu1 %754 }
 0x173   : > { %v580_v39 = vpop.f32.mrf.mxu0 }
 0x178   : > { %v626_v43 = vpop.f32.mrf.mxu2 }
 0x17a   : > { %v603_v40 = vpop.f32.mrf.mxu1 }
 0x17b   : > { %v604_v41 = vadd.f32 %v603_v40, %v580_v39  ;;  %v582_v49 = vpop.f32.mrf.mxu0 }
 0x17d   : > { %v676_v44 = vmul.f32 %v669_v42, %v604_v41  ;;  %v1022_v41 = vld [vmem:[%s1626_s3] sm:$0xff] }
 0x17f   : > { %v1528_v54 = vadd.f32 %v682_v47, %v676_v44 }
 0x180   : > { %v649_v48 = vpop.f32.mrf.mxu3  ;;  %v628_v60 = vpop.f32.mrf.mxu2 }
 0x181   : > { %v650_v52 = vadd.f32 %v649_v48, %v626_v43  ;;  %v692_v58 = vmax.f32 %v1528_v54, 0.0 }
 0x182   : > { %v605_v50 = vpop.f32.mrf.mxu1 }
 0x183   : > { %v606_v53 = vadd.f32 %v605_v50, %v582_v49  ;;  %v677_v57 = vmul.f32 %v669_v42, %v650_v52  ;;  %v585_v2 = vpop.f32.mrf.mxu0  ;;  %v1271_v52 = vmov 2  }
 0x184   : > { %1107 = vset.pattern.permute.xlu1 %v1271_v52  ;;  %1106 = vset.pattern.permute.xlu2 %v1271_v52 }
 0x185   : > { %v678_v55 = vmul.f32 %v674_v51, %v606_v53  ;;  %v1534_v4 = vadd.f32 %v682_v47, %v677_v57  ;;  %v773_v53 = vpop.permute.xlu0 %772 }
 0x187   : > { %v1531_v59 = vadd.f32 %v686_v56, %v678_v55  ;;  %v693_v1 = vmax.f32 %v1534_v4, 0.0 }
 0x188   : > { %v651_v61 = vpop.f32.mrf.mxu3  ;;  %v631_v14 = vpop.f32.mrf.mxu2 }
 0x189   : > { %v652_v62 = vadd.f32 %v651_v61, %v628_v60  ;;  %v694_v63 = vmax.f32 %v1531_v59, 0.0 }
 0x18a   : > { %v608_v0 = vpop.f32.mrf.mxu1 }
 0x18b   : > { %v679_v5 = vmul.f32 %v674_v51, %v652_v62  ;;  %v721_v6 = vpack.c.bf16 %v694_v63, %v692_v58  ;;  %v1553_v11 = vadd.f32 %v608_v0, %v585_v2  ;;  %v587_v16 = vpop.f32.mrf.mxu0  ;;  %v777_v62 = vpop.permute.xlu1 %776 }
 0x18d   : > { %733 = vmatpush.bf16.msrb.mxu1 %v721_v6  ;;  %v1543_v9 = vadd.f32 %v686_v56, %v679_v5 }
 0x18f   : > { %v695_v3 = vmax.f32 %v1543_v9, 0.0 }
 0x190   : > { %1004 = vmatmul.msk.bf16.vlgmr.msrb.gmra.mxu1 %vm561_vm8, %v720_v7  ;;  %v654_v12 = vpop.f32.mrf.mxu3  ;;  %v633_v19 = vpop.f32.mrf.mxu2 }
 0x191   : > { %v722_v10 = vpack.c.bf16 %v695_v3, %v693_v1  ;;  %v1555_v15 = vadd.f32 %v654_v12, %v631_v14  ;;  %v1272_v14 = vmov 3  }
 0x192   : > { %v610_v13 = vpop.f32.mrf.mxu1  ;;  %1108 = vset.pattern.permute.xlu0 %v1272_v14 }
 0x193   : > { %746 = vmatpush.bf16.msrb.mxu3 %v722_v10  ;;  %v1557_v17 = vadd.f32 %v610_v13, %v587_v16  ;;  %v590_v24 = vpop.f32.mrf.mxu0 }
 0x196   : > { %1005 = vmatmul.msk.bf16.vlgmr.msrb.gmra.mxu3 %vm561_vm8, %v720_v7 }
 0x198   : > { %v656_v18 = vpop.f32.mrf.mxu3  ;;  %v636_v26 = vpop.f32.mrf.mxu2 }
 0x199   : > { %v1559_v20 = vadd.f32 %v656_v18, %v633_v19 }
 0x19a   : > { %v613_v21 = vpop.f32.mrf.mxu1 }
 0x19b   : > { %v592_v8 = vpop.f32.mrf.mxu0  ;;  %v614_v29 = vadd.f32 %v613_v21, %v590_v24 }
 0x1a0   : > { %v659_v22 = vpop.f32.mrf.mxu3  ;;  %v638_v27 = vpop.f32.mrf.mxu2 }
 0x1a1   : > { %v660_v39 = vadd.f32 %v659_v22, %v636_v26 }
 0x1a2   : > { %v615_v23 = vpop.f32.mrf.mxu1 }
 0x1a8   : > { %v661_v25 = vpop.f32.mrf.mxu3 }
 0x20d   : > { %v735_v30 = vpop.f32.mrf.mxu1 }
 0x20e   : > { %v736_v32 = vadd.f32 %v735_v30, %v614_v29 }
 0x210   : > { %v757_v33 = vmul.f32 %v755_v31, %v736_v32 }
 0x212   : > { %v763_v35 = vadd.f32 %v761_v34, %v757_v33 }
 0x214   : > { %v765_v36 = vmax.f32 %v763_v35, 0.0 }
 0x215   : > { %v737_v37 = vpop.f32.mrf.mxu1 }
 0x216   : > { %v769_v38 = vpack.c.bf16 %v765_v36, %v765_v36 }
 0x218   : > { %v790_v40 = vsel %vm788_vm9, %v769_v38, 0 }
 0x219   : > { %v748_v42 = vpop.f32.mrf.mxu3  ;;  %802 = vmatpush.bf16.msra.mxu1 %v790_v40 }
 0x21a   : > { %v749_v43 = vadd.f32 %v748_v42, %v660_v39 }
 0x21c   : > { %v758_v44 = vmul.f32 %v755_v31, %v749_v43  ;;  %1010 = vmatmul.msk.bf16.vlgmr.msra.gmra.mxu1 %vm784_vm10, %v1022_v41 }
 0x21e   : > { %v764_v47 = vadd.f32 %v761_v34, %v758_v44 }
 0x220   : > { %v766_v48 = vmax.f32 %v764_v47, 0.0 }
 0x221   : > { %v750_v49 = vpop.f32.mrf.mxu3 }
 0x222   : > { %v770_v50 = vpack.c.bf16 %v766_v48, %v766_v48 }
 0x224   : > { %v793_v51 = vsel %vm788_vm9, %v770_v50, 0 }
 0x225   : > { %816 = vmatpush.bf16.msra.mxu3 %v793_v51 }
 0x228   : > { %1011 = vmatmul.msk.bf16.vlgmr.msra.gmra.mxu3 %vm784_vm10, %v1022_v41 }
 0x299   : > { %v804_v55 = vpop.f32.mrf.mxu1 }
 0x29a   : > { %v805_v56 = vadd.f32 %v804_v55, %v773_v53 }
 0x2a1   : > { %v806_v5 = vpop.f32.mrf.mxu1 }
 0x2a2   : > { %v807_v7 = vadd.f32 %v806_v5, %v777_v62 }
 0x2ab   : > { %v818_v57 = vpop.f32.mrf.mxu3 }
 0x2ac   : > { %v819_v60 = vadd.f32 %v818_v57, %v773_v53 }
 0x2ae   : > { %v823_v61 = vmax.f32 %v805_v56, %v819_v60 }
 0x2b0   : > { %824 = vmax.xlane.f32.xlu2 %v823_v61 }
 0x2b3   : > { %v820_v6 = vpop.f32.mrf.mxu3 }
 0x2b4   : > { %v821_v10 = vadd.f32 %v820_v6, %v777_v62 }
 0x2b6   : > { %v826_v0 = vmax.f32 %v807_v7, %v821_v10 }
 0x2b8   : > { %827 = vmax.xlane.f32.xlu1 %v826_v0 }
 0x2c8   : > { %697 = vperm.xlu2 %1106, %v1500_v45  }
 0x2d0   : > { %1109 = vset.pattern.permute.xlu2 %v1272_v14 }
 0x2d1   : > { %701 = vperm.xlu1 %1107, %v1505_v46  }
 0x323   : > { %v825_v2 = vpop.xlane.xlu2 %824 }
 0x324   : > { %v829_v12 = vsub.f32 %v805_v56, %v825_v2  ;;  %v830_v13 = vsub.f32 %v819_v60, %v825_v2 }
 0x326   : > { %v833_v16 = vmul.f32 1.442695, %v829_v12  ;;  %v835_v18 = vmul.f32 1.442695, %v830_v13 }
 0x328   : > { %1111 = vpow2.f32 %v833_v16 }
 0x329   : > { %1113 = vpow2.f32 %v835_v18 }
 0x32b   : > { %v828_v19 = vpop.xlane.xlu1 %827  ;;  %v698_v31 = vpop.permute.xlu2 %697 }
 0x32c   : > { %v831_v21 = vsub.f32 %v807_v7, %v828_v19  ;;  %v832_v22 = vsub.f32 %v821_v10, %v828_v19  ;;  %v705_v42 = vmul.f32 %v698_v31, %v1555_v15 }
 0x32e   : > { %v1112_v23 = vpop.eup %1111  ;;  %v837_v24 = vmul.f32 1.442695, %v831_v21  ;;  %v839_v25 = vmul.f32 1.442695, %v832_v22 }
 0x32f   : > { %v1114_v26 = vpop.eup %1113 }
 0x330   : > { %1115 = vpow2.f32 %v837_v24  ;;  %v841_v8 = vadd.f32 %v1114_v26, %v1112_v23 }
 0x331   : > { %1117 = vpow2.f32 %v839_v25 }
 0x332   : > { %842 = vadd.xlane.f32.xlu0 %v841_v8 }
 0x336   : > { %v1116_v27 = vpop.eup %1115 }
 0x337   : > { %v1118_v29 = vpop.eup %1117 }
 0x338   : > { %v844_v30 = vadd.f32 %v1118_v29, %v1116_v27 }
 0x33a   : > { %845 = vadd.xlane.f32.xlu2 %v844_v30 }
 0x343   : > { %v702_v34 = vpop.permute.xlu1 %701 }
 0x344   : > { %v706_v36 = vmul.f32 %v702_v34, %v1557_v17  ;;  %v707_v37 = vmul.f32 %v702_v34, %v1559_v20 }
 0x346   : > { %709 = vperm.xlu0 %1108, %v1500_v45  }
 0x34e   : > { %1110 = vset.pattern.permute.xlu0 %v1270_v28 }
 0x352   : > { %713 = vperm.xlu2 %1109, %v1505_v46   ;;  %v704_v46 = vmul.f32 %v698_v31, %v1553_v11 }
 0x3a5   : > { %v843_v32 = vpop.xlane.xlu0 %842 }
 0x3ad   : > { %v846_v33 = vpop.xlane.xlu2 %845 }
 0x3ae   : > { %1119 = vrcp.f32 %v846_v33 }
 0x3af   : > { %1121 = vrcp.f32 %v843_v32 }
 0x3b4   : > { %v1120_v35 = vpop.eup %1119 }
 0x3b5   : > { %v851_v38 = vmul.f32 %v1120_v35, %v1116_v27  ;;  %v852_v39 = vmul.f32 %v1120_v35, %v1118_v29  ;;  %v714_v40 = vpop.permute.xlu2 %713  ;;  %v1122_v45 = vpop.eup %1121 }
 0x3b6   : > { %v718_v28 = vadd.f32 %v714_v40, %v706_v36  ;;  %v719_v41 = vadd.f32 %v714_v40, %v707_v37  ;;  %v849_v17 = vmul.f32 %v1122_v45, %v1112_v23  ;;  %v850_v20 = vmul.f32 %v1122_v45, %v1114_v26 }
 0x3b8   : > { %v855_v43 = vmul.f32 %v851_v38, %v718_v28  ;;  %v856_v44 = vmul.f32 %v852_v39, %v719_v41  ;;  %v710_v47 = vpop.permute.xlu0 %709 }
 0x3b9   : > { %v716_v48 = vadd.f32 %v710_v47, %v704_v46  ;;  %v717_v49 = vadd.f32 %v710_v47, %v705_v42 }
 0x3ba   : > { %v859_v11 = vadd.f32 %v855_v43, %v694_v63  ;;  %v860_v15 = vadd.f32 %v856_v44, %v695_v3 }
 0x3bb   : > { %v853_v50 = vmul.f32 %v849_v17, %v716_v48  ;;  %v854_v51 = vmul.f32 %v850_v20, %v717_v49 }
 0x3bc   : > { %863 = vst [vmem:[%s315_s28 + $0x10] sm:$0xff] %v859_v11 }
 0x3bd   : > { %864 = vst [vmem:[%s315_s28 + $0x18] sm:$0xff] %v860_v15  ;;  %v857_v52 = vadd.f32 %v853_v50, %v692_v58  ;;  %v858_v53 = vadd.f32 %v854_v51, %v693_v1 }
 0x3bf   : > { %861 = vst [vmem:[%s315_s28] sm:$0xff] %v857_v52 }
 0x3c0   : > { %862 = vst [vmem:[%s315_s28 + $0x8] sm:$0xff] %v858_v53 }
 0x3c1   : > { %1210 = shalt.err (!%p1207_p10)
}
 0x3c2   : > { %s1273_s23 = smov 256  }
 0x3c3   : > { %1030 = dma.vmem_to_hbm [thread:$0]  (%p1381_p7), %s879_s13, 512, %s881_s30, %s866_s19, %s1273_s23, %s1273_s23, %s1265_s18  }
 0x3c4 PF: > { %s895_s1 = sand.u32 1, %s1241_s24   ;;  %p1638_p12 = scmp.ge.s32.totalorder %s1253_s27, 2 }
 0x3c5   : > { %s896_s29 = scalar_lea.sflag [#allocation4], %s895_s1 }
 0x3c6   : > { %p1041_p13 = pnand %p1638_p12, %p1349_p6 }
 0x3c8   : > { %p1042_p0 = pneg %p1041_p13 }
 0x3ca   : > { %1236 = dma.done.wait (%p1042_p0), %s896_s29, 512  }
 0x3cb   : > { %1238 = vsyncadd (%p1042_p0), %s896_s29, 4294966784  ;;  %p21_p3 = scmp.ge.s32.totalorder %s1367_s15, 4   ;;  %s1639_s24 = smov %s1245_s25 }
 0x3cc   : > { %s1640_s25 = smov %s1249_s26  ;;  %s1641_s26 = smov %s1377_s20 }
 0x3cd   : > { %s1642_s27 = smov %s1367_s15  ;;  %23 = sbr.rel (!%p21_p3) target bundleno = 8 (0x8), region = 104 }
 0x3d2   :  { %902 = vsyncpa [#allocation3], 1 }
 0x3d3   :  { %904 = vsyncpa [#allocation3 + $0x1], 1 }
 0x3d4   :  { %905 = vsyncpa [#allocation6], 1 }
 0x3d5   :  { %906 = vsyncpa [#allocation4], 1 }
 0x3d6   :  { %908 = vsyncpa [#allocation4 + $0x1], 1 }

</bundles_post_ra>
